<compile_context>
chip_gen: v7x
topology: tpu7x:2x2x1
jax: 0.10.0
libtpu: 0.0.40
codegen_flags: <defaults>
</compile_context>

<pallas_src>
import functools

import jax
import jax.numpy as jnp
from jax.experimental import pallas as pl
from jax.experimental.pallas import tpu as pltpu

_LANE = 128          # lane width: channel / contraction padding target
_MATMUL_ROW_CAP = 1024   # rows (M) per conv matmul tile
_EW_ROW_CAP = 2048       # rows per BN+ReLU elementwise tile (v7x-leaning)


def _round_up(x, m):
    return (x + m - 1) // m * m


def _pick_row_tile(m, cap):
    """Largest divisor of m that is a multiple of 8 and <= cap (m % 8 == 0)."""
    best = min(m, 8)
    d = 8
    while d <= min(m, cap):
        if m % d == 0:
            best = d
        d += 8
    return best


# ----------------------------- Pallas kernels ------------------------------

def _conv_stats_kernel(p_ref, w_ref, y_ref, s1_ref, s2_ref):
    """One (batch, row-tile) step of the fused conv-matmul + BN-stats kernel.

    p_ref : (1, TM, Kp)      bf16 tap-packed im2col patches tile
    w_ref : (Kp, Cout_p)     bf16 packed weights (VMEM-resident, constant block)
    y_ref : (1, TM, Cout_p)  f32 pre-BN conv output tile
    s1_ref: (1, 1, Cout_p)   f32 per-batch per-channel sum   (resident over r)
    s2_ref: (1, 1, Cout_p)   f32 per-batch per-channel sum^2 (resident over r)
    """
    r = pl.program_id(1)
    # Single MXU dot over the packed-tap contraction; bf16 in, f32 accumulate.
    y = jnp.dot(p_ref[0], w_ref[...], preferred_element_type=jnp.float32)
    y_ref[0] = y

    s1 = jnp.sum(y, axis=0, keepdims=True)
    s2 = jnp.sum(y * y, axis=0, keepdims=True)

    @pl.when(r == 0)
    def _():
        s1_ref[0] = s1
        s2_ref[0] = s2

    @pl.when(r > 0)
    def _():
        s1_ref[0] = s1_ref[0] + s1
        s2_ref[0] = s2_ref[0] + s2


def _bn_relu_kernel(y_ref, scale_ref, shift_ref, o_ref):
    # y_ref/o_ref: (TM, Cp); scale/shift: (1, Cp) VMEM-resident per-channel affine
    o_ref[...] = jnp.maximum(y_ref[...] * scale_ref[...] + shift_ref[...], 0.0)


# ------------------------------ Pallas wrappers -----------------------------

def _im2col_3x3(x_nhwc, stride, kp):
    """Tap-packed patches: (N,H,W,C) -> (N, Mb_pad, Kp) bf16, K index =
    (kh*3+kw)*C + c.  Rows beyond Ho*Wo (if any) are zero (stats-neutral)."""
    n, h, w, c = x_nhwc.shape
    ho = (h + 2 - 3) // stride + 1
    wo = (w + 2 - 3) // stride + 1
    xp = jnp.pad(x_nhwc, ((0, 0), (1, 1), (1, 1), (0, 0)))
    taps = []
    for kh in range(3):
        for kw in range(3):
            taps.append(jax.lax.slice(
                xp, (0, kh, kw, 0),
                (n, kh + (ho - 1) * stride + 1, kw + (wo - 1) * stride + 1, c),
                (1, stride, stride, 1)))
    patches = jnp.concatenate(taps, axis=-1).reshape(n, ho * wo, 9 * c)
    mb = ho * wo
    mb_pad = _round_up(mb, 8)
    patches = jnp.pad(patches, ((0, 0), (0, mb_pad - mb), (0, kp - 9 * c)))
    return patches.astype(jnp.bfloat16), ho, wo, mb_pad


def conv3x3_bn_stats(x_nhwc, w_packed, stride):
    """Fused 3x3 conv (padding=1, given stride) + per-channel batch statistics.

    Returns (y, ssum, ssq, (ho, wo, mb_pad)) with y = (N, Mb_pad, Cout_p) f32
    pre-BN conv output.  Conv bias omitted: it cancels in training-mode BN.
    """
    n = x_nhwc.shape[0]
    kp, coutp = w_packed.shape
    patches, ho, wo, mb_pad = _im2col_3x3(x_nhwc, stride, kp)

    tm = _pick_row_tile(mb_pad, _MATMUL_ROW_CAP)
    rt = mb_pad // tm

    tile_bytes = (2 * tm * kp * 2        # bf16 patches tile, double-buffered
                  + kp * coutp * 2       # resident bf16 weights
                  + 2 * tm * coutp * 4   # f32 conv-out tile, double-buffered
                  + 4 * 2 * coutp * 4)   # resident stats blocks
    vmem_limit = int(min(64 << 20, max(16 << 20, 2 * tile_bytes)))

    y, s1, s2 = pl.pallas_call(
        _conv_stats_kernel,
        out_shape=(
            jax.ShapeDtypeStruct((n, mb_pad, coutp), jnp.float32),
            jax.ShapeDtypeStruct((n, 1, coutp), jnp.float32),
            jax.ShapeDtypeStruct((n, 1, coutp), jnp.float32),
        ),
        grid=(n, rt),
        in_specs=[
            pl.BlockSpec((1, tm, kp), lambda b, r: (b, r, 0)),
            pl.BlockSpec((kp, coutp), lambda b, r: (0, 0)),   # VMEM resident
        ],
        out_specs=(
            pl.BlockSpec((1, tm, coutp), lambda b, r: (b, r, 0)),
            pl.BlockSpec((1, 1, coutp), lambda b, r: (b, 0, 0)),
            pl.BlockSpec((1, 1, coutp), lambda b, r: (b, 0, 0)),
        ),
        compiler_params=pltpu.CompilerParams(
            dimension_semantics=("parallel", "arbitrary"),
            vmem_limit_bytes=vmem_limit),
    )(patches, w_packed)

    ssum = jnp.sum(s1[:, 0, :], axis=0)   # tiny (N, Cp) reduction in XLA
    ssq = jnp.sum(s2[:, 0, :], axis=0)
    return y, ssum, ssq, (ho, wo, mb_pad)


def bn_relu_apply(y, ssum, ssq, count, gamma_p, beta_p, eps=1e-5):
    """Training-mode BatchNorm (biased batch variance) + ReLU from fused stats,
    written in place over the conv output (input_output_aliases)."""
    n, mb_pad, coutp = y.shape
    mean = ssum / count
    var = jnp.maximum(ssq / count - mean * mean, 0.0)
    scale = (gamma_p * jax.lax.rsqrt(var + eps)).astype(jnp.float32)
    shift = (beta_p - mean * scale).astype(jnp.float32)

    y2d = y.reshape(n * mb_pad, coutp)
    m = n * mb_pad
    tm = _pick_row_tile(m, _EW_ROW_CAP)

    tile_bytes = 2 * 2 * tm * coutp * 4 + 2 * coutp * 4
    vmem_limit = int(min(64 << 20, max(16 << 20, 2 * tile_bytes)))

    out = pl.pallas_call(
        _bn_relu_kernel,
        out_shape=jax.ShapeDtypeStruct((m, coutp), jnp.float32),
        grid=(m // tm,),
        in_specs=[
            pl.BlockSpec((tm, coutp), lambda i: (i, 0)),
            pl.BlockSpec((1, coutp), lambda i: (0, 0)),
            pl.BlockSpec((1, coutp), lambda i: (0, 0)),
        ],
        out_specs=pl.BlockSpec((tm, coutp), lambda i: (i, 0)),
        input_output_aliases={0: 0},
        compiler_params=pltpu.CompilerParams(
            dimension_semantics=("parallel",),
            vmem_limit_bytes=vmem_limit),
    )(y2d, scale.reshape(1, coutp), shift.reshape(1, coutp))
    return out.reshape(n, mb_pad, coutp)


# ------------------------------ block forward -------------------------------

def _pack_weights(w_oihw, kp, coutp):
    """(Cout, Cin, 3, 3) -> (Kp, Cout_p) bf16 with K index = (kh*3+kw)*Cin+c."""
    cout, cin = w_oihw.shape[0], w_oihw.shape[1]
    wk = jnp.transpose(w_oihw, (2, 3, 1, 0)).reshape(9 * cin, cout)
    wk = jnp.pad(wk, ((0, kp - 9 * cin), (0, coutp - cout)))
    return wk.astype(jnp.bfloat16)


def _pad_vec(v, cp):
    return jnp.pad(v, (0, cp - v.shape[0]))


@functools.partial(jax.jit, static_argnames=("stride",))
def basic_encoder_plain_block(x_nchw, params, stride):
    """Pallas implementation of BasicEncoderPlainBlock.forward (NCHW in/out)."""
    n, cin, h, w = x_nchw.shape
    cout = params["w1"].shape[0]
    kp1 = _round_up(9 * cin, _LANE)
    kp2 = _round_up(9 * cout, _LANE)
    coutp = _round_up(cout, _LANE)

    x = jnp.transpose(x_nchw, (0, 2, 3, 1))          # NCHW -> NHWC (once)

    w1 = _pack_weights(params["w1"], kp1, coutp)
    w2 = _pack_weights(params["w2"], kp2, coutp)
    g1, be1 = _pad_vec(params["g1"], coutp), _pad_vec(params["be1"], coutp)
    g2, be2 = _pad_vec(params["g2"], coutp), _pad_vec(params["be2"], coutp)
    # conv biases (params["b1"], params["b2"]) intentionally dropped:
    # training-mode BN subtracts the batch mean right after, so they cancel.

    # --- layer 1: conv(stride) + fused BN stats, then BN+ReLU apply ---------
    y, ssum, ssq, (ho1, wo1, _) = conv3x3_bn_stats(x, w1, stride)
    a1 = bn_relu_apply(y, ssum, ssq, n * ho1 * wo1, g1, be1)
    a1 = a1[:, :ho1 * wo1, :cout].reshape(n, ho1, wo1, cout)

    # --- layer 2: conv(stride=1) + fused BN stats, then BN+ReLU apply -------
    y, ssum, ssq, (ho2, wo2, _) = conv3x3_bn_stats(a1, w2, 1)
    a2 = bn_relu_apply(y, ssum, ssq, n * ho2 * wo2, g2, be2)
    a2 = a2[:, :ho2 * wo2, :cout].reshape(n, ho2, wo2, cout)

    return jnp.transpose(a2, (0, 3, 1, 2))            # NHWC -> NCHW


# ------------------------- pure-JAX reference check -------------------------

def _ref_forward(x_nchw, params, stride, eps=1e-5):
    def conv(x, wt, b, s):
        y = jax.lax.conv_general_dilated(
            x, wt, (s, s), ((1, 1), (1, 1)),
            dimension_numbers=("NCHW", "OIHW", "NCHW"))
        return y + b.reshape(1, -1, 1, 1)

    def bnrelu(y, g, be):
        mean = jnp.mean(y, axis=(0, 2, 3), keepdims=True)
        var = jnp.mean((y - mean) ** 2, axis=(0, 2, 3), keepdims=True)
        yhat = (y - mean) / jnp.sqrt(var + eps)
        return jnp.maximum(
            yhat * g.reshape(1, -1, 1, 1) + be.reshape(1, -1, 1, 1), 0.0)

    y = bnrelu(conv(x_nchw, params["w1"], params["b1"], stride),
               params["g1"], params["be1"])
    y = bnrelu(conv(y, params["w2"], params["b2"], 1),
               params["g2"], params["be2"])
    return y


# ----------------------------------- main -----------------------------------

if __name__ == "__main__":
    N, Cin, Cout, H, W = 2, 4, 8, 16, 16
    stride = 2

    key = jax.random.PRNGKey(0)
    k = jax.random.split(key, 9)
    params = {
        "w1": 0.1 * jax.random.normal(k[0], (Cout, Cin, 3, 3), jnp.float32),
        "b1": 0.1 * jax.random.normal(k[1], (Cout,), jnp.float32),
        "g1": 1.0 + 0.1 * jax.random.normal(k[2], (Cout,), jnp.float32),
        "be1": 0.1 * jax.random.normal(k[3], (Cout,), jnp.float32),
        "w2": 0.1 * jax.random.normal(k[4], (Cout, Cout, 3, 3), jnp.float32),
        "b2": 0.1 * jax.random.normal(k[5], (Cout,), jnp.float32),
        "g2": 1.0 + 0.1 * jax.random.normal(k[6], (Cout,), jnp.float32),
        "be2": 0.1 * jax.random.normal(k[7], (Cout,), jnp.float32),
    }
    x = jax.random.normal(k[8], (N, Cin, H, W), jnp.float32)

    out = jax.block_until_ready(basic_encoder_plain_block(x, params, stride))
    ref = jax.block_until_ready(_ref_forward(x, params, stride))

    assert out.shape == ref.shape == (N, Cout, H // stride, W // stride), out.shape
    err = float(jnp.max(jnp.abs(out - ref)))
    # bf16 MXU operands (BN stats stay f32) -> tolerance loosened vs pure-f32.
    assert jnp.allclose(out, ref, atol=5e-2, rtol=5e-2), err

    print("KERNEL_OK")
</pallas_src>

<mosaic_0001>
module attributes {stable_mosaic.version = 11 : i64} {
  func.func @_conv_stats_kernel(%arg0: i32, %arg1: i32, %arg2: memref<1x64x128xbf16, #tpu.memory_space<vmem>>, %arg3: memref<128x128xbf16, #tpu.memory_space<vmem>>, %arg4: memref<1x64x128xf32, #tpu.memory_space<vmem>>, %arg5: memref<1x1x128xf32, #tpu.memory_space<vmem>>, %arg6: memref<1x1x128xf32, #tpu.memory_space<vmem>>) attributes {dimension_semantics = [#tpu.dimension_semantics<parallel>, #tpu.dimension_semantics<arbitrary>], iteration_bounds = array<i64: 2, 1>, scalar_prefetch = 0 : i64, scratch_operands = 0 : i64, tpu.core_type = #tpu.core_type<tc>, window_params = [{transform_indices = @transform_0, window_bounds = array<i64: 1, 64, 128>}, {pipeline_mode = #tpu.pipeline_mode<synchronous>, transform_indices = @transform_1, window_bounds = array<i64: 128, 128>}, {transform_indices = @transform_2, window_bounds = array<i64: 1, 64, 128>}, {transform_indices = @transform_3, window_bounds = array<i64: 1, 1, 128>}, {transform_indices = @transform_4, window_bounds = array<i64: 1, 1, 128>}]} {
    %c0 = arith.constant 0 : index
    %c0_0 = arith.constant 0 : index
    %c0_1 = arith.constant 0 : index
    %0 = vector.load %arg2[%c0, %c0_0, %c0_1] : memref<1x64x128xbf16, #tpu.memory_space<vmem>>, vector<1x64x128xbf16>
    %1 = vector.shape_cast %0 : vector<1x64x128xbf16> to vector<64x128xbf16>
    %c0_2 = arith.constant 0 : index
    %c0_3 = arith.constant 0 : index
    %2 = vector.load %arg3[%c0_2, %c0_3] : memref<128x128xbf16, #tpu.memory_space<vmem>>, vector<128x128xbf16>
    %cst = arith.constant dense<0.000000e+00> : vector<64x128xf32>
    %3 = tpu.matmul %1, %2, %cst {dimension_numbers = #tpu.dot_dimension_numbers<[1], [0], [0], [1], [0, 0, 1, 1], [], []>} : vector<64x128xbf16>, vector<128x128xbf16>, vector<64x128xf32> -> vector<64x128xf32>
    %c0_4 = arith.constant 0 : index
    %c0_5 = arith.constant 0 : index
    %c0_6 = arith.constant 0 : index
    %4 = vector.load %arg4[%c0_4, %c0_5, %c0_6] : memref<1x64x128xf32, #tpu.memory_space<vmem>>, vector<1x64x128xf32>
    %5 = vector.shape_cast %4 : vector<1x64x128xf32> to vector<64x128xf32>
    %6 = vector.shape_cast %3 : vector<64x128xf32> to vector<1x64x128xf32>
    tpu.vector_store %arg4[%c0_4, %c0_5, %c0_6], %6 {strides = array<i32>} : memref<1x64x128xf32, #tpu.memory_space<vmem>>, vector<1x64x128xf32>,
    %cst_7 = arith.constant dense<0.000000e+00> : vector<128xf32>
    %7 = vector.multi_reduction <add>, %3, %cst_7 [0] : vector<64x128xf32> to vector<128xf32>
    %8 = vector.shape_cast %7 : vector<128xf32> to vector<1x128xf32>
    %9 = arith.mulf %3, %3 : vector<64x128xf32>
    %cst_8 = arith.constant dense<0.000000e+00> : vector<128xf32>
    %10 = vector.multi_reduction <add>, %9, %cst_8 [0] : vector<64x128xf32> to vector<128xf32>
    %11 = vector.shape_cast %10 : vector<128xf32> to vector<1x128xf32>
    %c0_i32 = arith.constant 0 : i32
    %12 = arith.cmpi eq, %arg1, %c0_i32 : i32
    %13 = arith.extui %12 : i1 to i32
    %c0_i32_9 = arith.constant 0 : i32
    %14 = arith.cmpi ne, %13, %c0_i32_9 : i32
    scf.if %14 {
      %c0_12 = arith.constant 0 : index
      %c0_13 = arith.constant 0 : index
      %c0_14 = arith.constant 0 : index
      %18 = vector.load %arg5[%c0_12, %c0_13, %c0_14] : memref<1x1x128xf32, #tpu.memory_space<vmem>>, vector<1x1x128xf32>
      %19 = vector.shape_cast %18 : vector<1x1x128xf32> to vector<1x128xf32>
      %20 = vector.shape_cast %8 : vector<1x128xf32> to vector<1x1x128xf32>
      tpu.vector_store %arg5[%c0_12, %c0_13, %c0_14], %20 {strides = array<i32>} : memref<1x1x128xf32, #tpu.memory_space<vmem>>, vector<1x1x128xf32>,
      %c0_15 = arith.constant 0 : index
      %c0_16 = arith.constant 0 : index
      %c0_17 = arith.constant 0 : index
      %21 = vector.load %arg6[%c0_15, %c0_16, %c0_17] : memref<1x1x128xf32, #tpu.memory_space<vmem>>, vector<1x1x128xf32>
      %22 = vector.shape_cast %21 : vector<1x1x128xf32> to vector<1x128xf32>
      %23 = vector.shape_cast %11 : vector<1x128xf32> to vector<1x1x128xf32>
      tpu.vector_store %arg6[%c0_15, %c0_16, %c0_17], %23 {strides = array<i32>} : memref<1x1x128xf32, #tpu.memory_space<vmem>>, vector<1x1x128xf32>,
    } else {
    }
    %c0_i32_10 = arith.constant 0 : i32
    %15 = arith.cmpi sgt, %arg1, %c0_i32_10 : i32
    %16 = arith.extui %15 : i1 to i32
    %c0_i32_11 = arith.constant 0 : i32
    %17 = arith.cmpi ne, %16, %c0_i32_11 : i32
    scf.if %17 {
      %c0_12 = arith.constant 0 : index
      %c0_13 = arith.constant 0 : index
      %c0_14 = arith.constant 0 : index
      %18 = vector.load %arg5[%c0_12, %c0_13, %c0_14] : memref<1x1x128xf32, #tpu.memory_space<vmem>>, vector<1x1x128xf32>
      %19 = vector.shape_cast %18 : vector<1x1x128xf32> to vector<1x128xf32>
      %20 = arith.addf %19, %8 : vector<1x128xf32>
      %c0_15 = arith.constant 0 : index
      %c0_16 = arith.constant 0 : index
      %c0_17 = arith.constant 0 : index
      %21 = vector.load %arg5[%c0_15, %c0_16, %c0_17] : memref<1x1x128xf32, #tpu.memory_space<vmem>>, vector<1x1x128xf32>
      %22 = vector.shape_cast %21 : vector<1x1x128xf32> to vector<1x128xf32>
      %23 = vector.shape_cast %20 : vector<1x128xf32> to vector<1x1x128xf32>
      tpu.vector_store %arg5[%c0_15, %c0_16, %c0_17], %23 {strides = array<i32>} : memref<1x1x128xf32, #tpu.memory_space<vmem>>, vector<1x1x128xf32>,
      %c0_18 = arith.constant 0 : index
      %c0_19 = arith.constant 0 : index
      %c0_20 = arith.constant 0 : index
      %24 = vector.load %arg6[%c0_18, %c0_19, %c0_20] : memref<1x1x128xf32, #tpu.memory_space<vmem>>, vector<1x1x128xf32>
      %25 = vector.shape_cast %24 : vector<1x1x128xf32> to vector<1x128xf32>
      %26 = arith.addf %25, %11 : vector<1x128xf32>
      %c0_21 = arith.constant 0 : index
      %c0_22 = arith.constant 0 : index
      %c0_23 = arith.constant 0 : index
      %27 = vector.load %arg6[%c0_21, %c0_22, %c0_23] : memref<1x1x128xf32, #tpu.memory_space<vmem>>, vector<1x1x128xf32>
      %28 = vector.shape_cast %27 : vector<1x1x128xf32> to vector<1x128xf32>
      %29 = vector.shape_cast %26 : vector<1x128xf32> to vector<1x1x128xf32>
      tpu.vector_store %arg6[%c0_21, %c0_22, %c0_23], %29 {strides = array<i32>} : memref<1x1x128xf32, #tpu.memory_space<vmem>>, vector<1x1x128xf32>,
    } else {
    }
    return
  }
  func.func @transform_0(%arg0: i32, %arg1: i32) -> (i32, i32, i32) {
    %c0_i32 = arith.constant 0 : i32
    %c0_i32_0 = arith.constant 0 : i32
    return %arg0, %arg1, %c0_i32 : i32, i32, i32
  }
  func.func @transform_1(%arg0: i32, %arg1: i32) -> (i32, i32) {
    %c0_i32 = arith.constant 0 : i32
    %c0_i32_0 = arith.constant 0 : i32
    %c0_i32_1 = arith.constant 0 : i32
    return %c0_i32, %c0_i32_0 : i32, i32
  }
  func.func @transform_2(%arg0: i32, %arg1: i32) -> (i32, i32, i32) {
    %c0_i32 = arith.constant 0 : i32
    %c0_i32_0 = arith.constant 0 : i32
    return %arg0, %arg1, %c0_i32 : i32, i32, i32
  }
  func.func @transform_3(%arg0: i32, %arg1: i32) -> (i32, i32, i32) {
    %c0_i32 = arith.constant 0 : i32
    %c0_i32_0 = arith.constant 0 : i32
    %c0_i32_1 = arith.constant 0 : i32
    return %arg0, %c0_i32, %c0_i32_0 : i32, i32, i32
  }
  func.func @transform_4(%arg0: i32, %arg1: i32) -> (i32, i32, i32) {
    %c0_i32 = arith.constant 0 : i32
    %c0_i32_0 = arith.constant 0 : i32
    %c0_i32_1 = arith.constant 0 : i32
    return %arg0, %c0_i32, %c0_i32_0 : i32, i32, i32
  }
}

module attributes {stable_mosaic.version = 11 : i64} {
  func.func @_bn_relu_kernel(%arg0: i32, %arg1: memref<128x128xf32, #tpu.memory_space<vmem>>, %arg2: memref<1x128xf32, #tpu.memory_space<vmem>>, %arg3: memref<1x128xf32, #tpu.memory_space<vmem>>, %arg4: memref<128x128xf32, #tpu.memory_space<vmem>>) attributes {dimension_semantics = [#tpu.dimension_semantics<parallel>], iteration_bounds = array<i64: 1>, scalar_prefetch = 0 : i64, scratch_operands = 0 : i64, tpu.core_type = #tpu.core_type<tc>, window_params = [{transform_indices = @transform_0, window_bounds = array<i64: 128, 128>}, {pipeline_mode = #tpu.pipeline_mode<synchronous>, transform_indices = @transform_1, window_bounds = array<i64: 1, 128>}, {pipeline_mode = #tpu.pipeline_mode<synchronous>, transform_indices = @transform_2, window_bounds = array<i64: 1, 128>}, {transform_indices = @transform_3, window_bounds = array<i64: 128, 128>}]} {
    %c0 = arith.constant 0 : index
    %c0_0 = arith.constant 0 : index
    %0 = vector.load %arg1[%c0, %c0_0] : memref<128x128xf32, #tpu.memory_space<vmem>>, vector<128x128xf32>
    %c0_1 = arith.constant 0 : index
    %c0_2 = arith.constant 0 : index
    %1 = vector.load %arg2[%c0_1, %c0_2] : memref<1x128xf32, #tpu.memory_space<vmem>>, vector<1x128xf32>
    %2 = vector.broadcast %1 : vector<1x128xf32> to vector<128x128xf32>
    %3 = arith.mulf %0, %2 : vector<128x128xf32>
    %c0_3 = arith.constant 0 : index
    %c0_4 = arith.constant 0 : index
    %4 = vector.load %arg3[%c0_3, %c0_4] : memref<1x128xf32, #tpu.memory_space<vmem>>, vector<1x128xf32>
    %5 = vector.broadcast %4 : vector<1x128xf32> to vector<128x128xf32>
    %6 = arith.addf %3, %5 : vector<128x128xf32>
    %cst = arith.constant 0.000000e+00 : f32
    %7 = vector.broadcast %cst : f32 to vector<128x128xf32>
    %8 = arith.maximumf %6, %7 : vector<128x128xf32>
    %c0_5 = arith.constant 0 : index
    %c0_6 = arith.constant 0 : index
    %9 = vector.load %arg4[%c0_5, %c0_6] : memref<128x128xf32, #tpu.memory_space<vmem>>, vector<128x128xf32>
    tpu.vector_store %arg4[%c0_5, %c0_6], %8 {strides = array<i32>} : memref<128x128xf32, #tpu.memory_space<vmem>>, vector<128x128xf32>,
    return
  }
  func.func @transform_0(%arg0: i32) -> (i32, i32) {
    %c0_i32 = arith.constant 0 : i32
    %c0_i32_0 = arith.constant 0 : i32
    return %arg0, %c0_i32 : i32, i32
  }
  func.func @transform_1(%arg0: i32) -> (i32, i32) {
    %c0_i32 = arith.constant 0 : i32
    %c0_i32_0 = arith.constant 0 : i32
    %c0_i32_1 = arith.constant 0 : i32
    return %c0_i32, %c0_i32_0 : i32, i32
  }
  func.func @transform_2(%arg0: i32) -> (i32, i32) {
    %c0_i32 = arith.constant 0 : i32
    %c0_i32_0 = arith.constant 0 : i32
    %c0_i32_1 = arith.constant 0 : i32
    return %c0_i32, %c0_i32_0 : i32, i32
  }
  func.func @transform_3(%arg0: i32) -> (i32, i32) {
    %c0_i32 = arith.constant 0 : i32
    %c0_i32_0 = arith.constant 0 : i32
    return %arg0, %c0_i32 : i32, i32
  }
}

</mosaic_0001>

<bundles_post_ra>
// kernel: basic_encoder_plain_block.5
= control target key start
LH: loop header
LB: loop body
LE: loop exit
PB: predicated region body
PF: predicated region fallthrough
CT: control target
= control target key end

     0   :  { %s254_s0 = inlined_call_operand.vmem [shape: f32[128,128], index: 0, kind: input, shape index: {}, may-alias: {0,3}]   ;;  %s255_s1 = inlined_call_operand.vmem [shape: f32[1,128], index: 1, kind: input, shape index: {}]   ;;  %s256_s2 = inlined_call_operand.vmem [shape: f32[1,128], index: 2, kind: input, shape index: {}]   ;;  %s257_s3 = inlined_call_operand.vmem [shape: f32[128,128], index: 3, kind: output, shape index: {}, may-alias: {0,3}]  }
   0x1   :  { %v14_v0 = vld [vmem:[%s254_s0] sm:$0xff]  ;;  %v15_v4 = vld [vmem:[%s254_s0 + $0x8] sm:$0xff]  ;;  %v16_v5 = vld [vmem:[%s254_s0 + $0x10] sm:$0xff] }
   0x2   :  { %v112_v1 = vld [vmem:[%s255_s1] ss:$0 sm:$0xff]  ;;  %v17_v6 = vld [vmem:[%s254_s0 + $0x18] sm:$0xff]  ;;  %v19_v11 = vld [vmem:[%s254_s0 + $0x28] sm:$0xff] }
   0x3   :  { %v143_v2 = vld [vmem:[%s256_s2] ss:$0 sm:$0xff]  ;;  %v37_v3 = vmul.f32 %v112_v1, %v14_v0  ;;  %v38_v7 = vmul.f32 %v112_v1, %v15_v4  ;;  %v39_v8 = vmul.f32 %v112_v1, %v16_v5  ;;  %v40_v9 = vmul.f32 %v112_v1, %v17_v6  ;;  %v20_v12 = vld [vmem:[%s254_s0 + $0x30] sm:$0xff]  ;;  %v21_v17 = vld [vmem:[%s254_s0 + $0x38] sm:$0xff] }
   0x4   :  { %v18_v10 = vld [vmem:[%s254_s0 + $0x20] sm:$0xff]  ;;  %v42_v15 = vmul.f32 %v112_v1, %v19_v11  ;;  %v43_v16 = vmul.f32 %v112_v1, %v20_v12  ;;  %v44_v21 = vmul.f32 %v112_v1, %v21_v17  ;;  %v23_v27 = vld [vmem:[%s254_s0 + $0x48] sm:$0xff]  ;;  %v24_v28 = vld [vmem:[%s254_s0 + $0x50] sm:$0xff] }
   0x5   :  { %v60_v13 = vadd.f32 %v143_v2, %v37_v3  ;;  %v41_v14 = vmul.f32 %v112_v1, %v18_v10  ;;  %v61_v18 = vadd.f32 %v143_v2, %v38_v7  ;;  %v62_v19 = vadd.f32 %v143_v2, %v39_v8  ;;  %v22_v22 = vld [vmem:[%s254_s0 + $0x40] sm:$0xff]  ;;  %v25_v29 = vld [vmem:[%s254_s0 + $0x58] sm:$0xff]  ;;  %v27_v35 = vld [vmem:[%s254_s0 + $0x68] sm:$0xff] }
   0x6   :  { %v63_v20 = vadd.f32 %v143_v2, %v40_v9  ;;  %v65_v25 = vadd.f32 %v143_v2, %v42_v15  ;;  %v66_v26 = vadd.f32 %v143_v2, %v43_v16  ;;  %v67_v33 = vadd.f32 %v143_v2, %v44_v21  ;;  %v26_v34 = vld [vmem:[%s254_s0 + $0x60] sm:$0xff]  ;;  %v28_v36 = vld [vmem:[%s254_s0 + $0x70] sm:$0xff] }
   0x7   :  { %v76_v23 = vmax.f32 %v60_v13, 0.0  ;;  %v64_v24 = vadd.f32 %v143_v2, %v41_v14  ;;  %v77_v30 = vmax.f32 %v61_v18, 0.0  ;;  %v78_v31 = vmax.f32 %v62_v19, 0.0 }
   0x8   :  { %v79_v32 = vmax.f32 %v63_v20, 0.0  ;;  %v81_v38 = vmax.f32 %v65_v25, 0.0  ;;  %v82_v39 = vmax.f32 %v66_v26, 0.0  ;;  %v45_v40 = vmul.f32 %v112_v1, %v22_v22 }
   0x9   :  { %92 = vst [vmem:[%s257_s3] sm:$0xff] %v76_v23  ;;  %v80_v37 = vmax.f32 %v64_v24, 0.0  ;;  %v83_v42 = vmax.f32 %v67_v33, 0.0  ;;  %v46_v43 = vmul.f32 %v112_v1, %v23_v27  ;;  %v47_v44 = vmul.f32 %v112_v1, %v24_v28 }
   0xa   :  { %v48_v45 = vmul.f32 %v112_v1, %v25_v29  ;;  %v68_v46 = vadd.f32 %v143_v2, %v45_v40  ;;  %v49_v47 = vmul.f32 %v112_v1, %v26_v34  ;;  %v50_v48 = vmul.f32 %v112_v1, %v27_v35 }
   0xb   :  { %v51_v49 = vmul.f32 %v112_v1, %v28_v36  ;;  %v69_v50 = vadd.f32 %v143_v2, %v46_v43  ;;  %v70_v51 = vadd.f32 %v143_v2, %v47_v44 }
   0xc   :  { %v71_v52 = vadd.f32 %v143_v2, %v48_v45  ;;  %v84_v54 = vmax.f32 %v68_v46, 0.0  ;;  %v72_v55 = vadd.f32 %v143_v2, %v49_v47  ;;  %v73_v56 = vadd.f32 %v143_v2, %v50_v48 }
   0xd   :  { %v74_v57 = vadd.f32 %v143_v2, %v51_v49  ;;  %v85_v58 = vmax.f32 %v69_v50, 0.0  ;;  %v86_v59 = vmax.f32 %v70_v51, 0.0 }
   0xe   :  { %v87_v60 = vmax.f32 %v71_v52, 0.0  ;;  %v88_v62 = vmax.f32 %v72_v55, 0.0  ;;  %v89_v63 = vmax.f32 %v73_v56, 0.0 }
   0xf   :  { %v90_v0 = vmax.f32 %v74_v57, 0.0 }
  0x10   :  { %v29_v41 = vld [vmem:[%s254_s0 + $0x78] sm:$0xff] }
  0x11   :  { %93 = vst [vmem:[%s257_s3 + $0x8] sm:$0xff] %v77_v30  ;;  %94 = vst [vmem:[%s257_s3 + $0x10] sm:$0xff] %v78_v31  ;;  %v52_v53 = vmul.f32 %v112_v1, %v29_v41 }
  0x12   :  { %95 = vst [vmem:[%s257_s3 + $0x18] sm:$0xff] %v79_v32  ;;  %96 = vst [vmem:[%s257_s3 + $0x20] sm:$0xff] %v80_v37 }
  0x13   :  { %97 = vst [vmem:[%s257_s3 + $0x28] sm:$0xff] %v81_v38  ;;  %98 = vst [vmem:[%s257_s3 + $0x30] sm:$0xff] %v82_v39  ;;  %v75_v61 = vadd.f32 %v143_v2, %v52_v53 }
  0x14   :  { %99 = vst [vmem:[%s257_s3 + $0x38] sm:$0xff] %v83_v42  ;;  %100 = vst [vmem:[%s257_s3 + $0x40] sm:$0xff] %v84_v54 }
  0x15   :  { %101 = vst [vmem:[%s257_s3 + $0x48] sm:$0xff] %v85_v58  ;;  %102 = vst [vmem:[%s257_s3 + $0x50] sm:$0xff] %v86_v59  ;;  %v91_v1 = vmax.f32 %v75_v61, 0.0 }
  0x16   :  { %103 = vst [vmem:[%s257_s3 + $0x58] sm:$0xff] %v87_v60  ;;  %104 = vst [vmem:[%s257_s3 + $0x60] sm:$0xff] %v88_v62 }
  0x17   :  { %105 = vst [vmem:[%s257_s3 + $0x68] sm:$0xff] %v89_v63  ;;  %106 = vst [vmem:[%s257_s3 + $0x70] sm:$0xff] %v90_v0 }
  0x18   :  { %107 = vst [vmem:[%s257_s3 + $0x78] sm:$0xff] %v91_v1 }

// kernel: basic_encoder_plain_block.4
= control target key start
LH: loop header
LB: loop body
LE: loop exit
PB: predicated region body
PF: predicated region fallthrough
CT: control target
= control target key end

     0   :  { %s773_s15 = smov 0   ;;  %s775_s16 = smov 0   ;;  %s848_s0 = inlined_call_operand.vmem [shape: bf16[2,64,128], index: 0, kind: input, shape index: {}]   ;;  %s849_s1 = inlined_call_operand.vmem [shape: bf16[128,128], index: 1, kind: input, shape index: {}]   ;;  %s850_s2 = inlined_call_operand.vmem [shape: f32[2,64,128], index: 2, kind: output, shape index: {0}]   ;;  %s851_s3 = inlined_call_operand.vmem [shape: f32[2,1,128], index: 3, kind: output, shape index: {1}]   ;;  %s852_s4 = inlined_call_operand.vmem [shape: f32[2,1,128], index: 4, kind: output, shape index: {2}]  }
   0x1   :  { %s777_s17 = smov 0  }
   0x2 LB: > { %s27_s18 = sadd.s32 1, %s742_s16  ;;  %p615_p0 = scmp.ge.s32.totalorder %s746_s17, 1  ;;  %s746_s17 = sphi %s777_s17, %s15_s17   ;;  %s742_s16 = sphi %s775_s16, %s854_s16   ;;  %s738_s15 = sphi %s773_s15, %s853_s15  }
   0x3   : > { %p29_p1 = scmp.ge.s32.totalorder %s27_s18, 2  ;;  %p188_p2 = scmp.lt.s32.totalorder %s746_s17, 3 }
   0x5   : > { %s856_s18 = smov (%p29_p1, %s27_s18), 0  ;;  %p189_p3 = pnand %p615_p0, %p188_p2 }
   0x6   : > { %v712_v0 = vld [vmem:[%s849_s1] sm:$0xff] (!%p189_p3)   ;;  %p229_p4 = scmp.lt.s32.totalorder (!%p189_p3), %s738_s15, 1  ;;  %v713_v1 = vld [vmem:[%s849_s1 + $0x8] sm:$0xff] (!%p189_p3)   ;;  %v714_v2 = vld [vmem:[%s849_s1 + $0x10] sm:$0xff] (!%p189_p3)  }
   0x7   : > { %192 = sbr.rel (%p189_p3) target bundleno = 283 (0x11b), region = 28  ;;  %648 = vmatprep.subr.bf16.mxu0 (!%p189_p3), %v712_v0  ;;  %672 = vmatprep.subr.bf16.mxu1 (!%p189_p3), %v712_v0  ;;  %v715_v3 = vld [vmem:[%s849_s1 + $0x18] sm:$0xff] (!%p189_p3)   ;;  %v716_v6 = vld [vmem:[%s849_s1 + $0x20] sm:$0xff] (!%p189_p3)   ;;  %v717_v7 = vld [vmem:[%s849_s1 + $0x28] sm:$0xff] (!%p189_p3)  }
   0x8   : > { %649 = vmatpush3.bf16.msra.mxu0 (!%p189_p3), %v712_v0  ;;  %680 = vmatpush3.bf16.msra.mxu1 (!%p189_p3), %v712_v0  ;;  %v718_v8 = vld [vmem:[%s849_s1 + $0x30] sm:$0xff] (!%p189_p3)   ;;  %v719_v9 = vld [vmem:[%s849_s1 + $0x38] sm:$0xff] (!%p189_p3)  }
   0x9   : > { %650 = vmatprep.subr.bf16.mxu0 (!%p189_p3), %v713_v1  ;;  %673 = vmatprep.subr.bf16.mxu1 (!%p189_p3), %v713_v1 }
   0xc   : > { %651 = vmatpush3.bf16.msra.mxu0 (!%p189_p3), %v713_v1  ;;  %681 = vmatpush3.bf16.msra.mxu1 (!%p189_p3), %v713_v1 }
   0xd   : > { %652 = vmatprep.subr.bf16.mxu0 (!%p189_p3), %v714_v2  ;;  %674 = vmatprep.subr.bf16.mxu1 (!%p189_p3), %v714_v2 }
   0xe   : > { %s858_s15 = smov (!%p229_p4, %s738_s15), 1 }
   0xf   : > { %s634_s25 = sshll.u32 %s858_s15, 5  ;;  %s635_s13 = sshll.u32 %s858_s15, 6 }
  0x10   : > { %s806_s28 = scalar_lea.vmem %s848_s0, %s634_s25  ;;  %653 = vmatpush3.bf16.msra.mxu0 %v714_v2  ;;  %682 = vmatpush3.bf16.msra.mxu1 %v714_v2  ;;  %s246_s20 = scalar_lea.vmem %s850_s2, %s635_s13 }
  0x11   : > { %v720_v4 = vld [vmem:[%s806_s28] sm:$0xff]   ;;  %v722_v5 = vld [vmem:[%s806_s28 + $0x10] sm:$0xff]   ;;  %654 = vmatprep.subr.bf16.mxu0 %v715_v3  ;;  %675 = vmatprep.subr.bf16.mxu1 %v715_v3  ;;  %v721_v10 = vld [vmem:[%s806_s28 + $0x8] sm:$0xff]   ;;  %s250_s23 = scalar_lea.vmem %s851_s3, %s858_s15  ;;  %s253_s26 = scalar_lea.vmem %s852_s4, %s858_s15 }
  0x12   : > { %664 = vmatprep.mubr.bf16.mxu0 %v720_v4  ;;  %668 = vmatprep.mubr.bf16.mxu1 %v722_v5  ;;  %v723_v11 = vld [vmem:[%s806_s28 + $0x18] sm:$0xff]  }
  0x14   : > { %655 = vmatpush3.bf16.msra.mxu0 %v715_v3  ;;  %683 = vmatpush3.bf16.msra.mxu1 %v715_v3 }
  0x15   : > { %656 = vmatprep.subr.bf16.mxu0 %v716_v6  ;;  %676 = vmatprep.subr.bf16.mxu1 %v716_v6 }
  0x18   : > { %657 = vmatpush3.bf16.msra.mxu0 %v716_v6  ;;  %684 = vmatpush3.bf16.msra.mxu1 %v716_v6 }
  0x19   : > { %658 = vmatprep.subr.bf16.mxu0 %v717_v7  ;;  %677 = vmatprep.subr.bf16.mxu1 %v717_v7 }
  0x1c   : > { %659 = vmatpush3.bf16.msra.mxu0 %v717_v7  ;;  %685 = vmatpush3.bf16.msra.mxu1 %v717_v7 }
  0x1d   : > { %660 = vmatprep.subr.bf16.mxu0 %v718_v8  ;;  %678 = vmatprep.subr.bf16.mxu1 %v718_v8 }
  0x20   : > { %661 = vmatpush3.bf16.msra.mxu0 %v718_v8  ;;  %686 = vmatpush3.bf16.msra.mxu1 %v718_v8 }
  0x21   : > { %662 = vmatprep.subr.bf16.mxu0 %v719_v9  ;;  %679 = vmatprep.subr.bf16.mxu1 %v719_v9 }
  0x24   : > { %663 = vmatpush3.bf16.msra.mxu0 %v719_v9  ;;  %687 = vmatpush3.bf16.msra.mxu1 %v719_v9 }
  0x27   : > { %665 = vmatmul.mubr.bf16.vlgmr.msra.gmra.mrb[0].mxu0 %v721_v10  ;;  %669 = vmatmul.mubr.bf16.vlgmr.msra.gmra.mrb[0].mxu1 %v723_v11 }
  0xfa   : > { %v666_v12 = vpop.f32.mrb[0].mxu0  ;;  %v670_v13 = vpop.f32.mrb[0].mxu1 }
  0xfb   : > { %418 = vst [vmem:[%s246_s20 + $0x10] sm:$0xff] %v666_v12  ;;  %v385_v14 = vpop.f32.mrb[1].mxu0  ;;  %422 = vst [vmem:[%s246_s20 + $0x30] sm:$0xff] %v670_v13  ;;  %v401_v15 = vpop.f32.mrb[1].mxu1  ;;  %v439_v23 = vmul.f32 %v666_v12, %v666_v12  ;;  %v443_v35 = vmul.f32 %v670_v13, %v670_v13 }
  0xfc   : > { %416 = vst [vmem:[%s246_s20] sm:$0xff] %v385_v14  ;;  %v667_v16 = vpop.f32.mrb[2].mxu0  ;;  %420 = vst [vmem:[%s246_s20 + $0x20] sm:$0xff] %v401_v15  ;;  %v671_v17 = vpop.f32.mrb[2].mxu1  ;;  %v437_v20 = vmul.f32 %v385_v14, %v385_v14  ;;  %v441_v29 = vmul.f32 %v401_v15, %v401_v15 }
  0xfd   : > { %419 = vst [vmem:[%s246_s20 + $0x18] sm:$0xff] %v667_v16  ;;  %v388_v18 = vpop.f32.mrb[3].mxu0  ;;  %423 = vst [vmem:[%s246_s20 + $0x38] sm:$0xff] %v671_v17  ;;  %v404_v19 = vpop.f32.mrb[3].mxu1  ;;  %v440_v26 = vmul.f32 %v667_v16, %v667_v16  ;;  %v444_v38 = vmul.f32 %v671_v17, %v671_v17 }
  0xfe   : > { %417 = vst [vmem:[%s246_s20 + $0x8] sm:$0xff] %v388_v18  ;;  %v424_v21 = vadd.f32 %v388_v18, %v385_v14  ;;  %v438_v22 = vmul.f32 %v388_v18, %v388_v18  ;;  %421 = vst [vmem:[%s246_s20 + $0x28] sm:$0xff] %v404_v19  ;;  %v442_v34 = vmul.f32 %v404_v19, %v404_v19 }
 0x100   : > { %v425_v24 = vadd.f32 %v666_v12, %v424_v21  ;;  %v445_v25 = vadd.f32 %v438_v22, %v437_v20 }
 0x102   : > { %v446_v27 = vadd.f32 %v445_v25, %v439_v23  ;;  %v426_v28 = vadd.f32 %v667_v16, %v425_v24 }
 0x104   : > { %v427_v30 = vadd.f32 %v426_v28, %v401_v15  ;;  %v447_v31 = vadd.f32 %v446_v27, %v440_v26 }
 0x106   : > { %v448_v32 = vadd.f32 %v447_v31, %v441_v29  ;;  %v428_v33 = vadd.f32 %v427_v30, %v404_v19 }
 0x108   : > { %v429_v36 = vadd.f32 %v670_v13, %v428_v33  ;;  %v449_v37 = vadd.f32 %v448_v32, %v442_v34 }
 0x10a   : > { %v430_v39 = vadd.f32 %v671_v17, %v429_v36  ;;  %v450_v40 = vadd.f32 %v449_v37, %v443_v35 }
 0x10c   : > { %v431_v41 = vrot.slane %v430_v39, 4  ;;  %v451_v42 = vadd.f32 %v450_v40, %v444_v38 }
 0x10e   : > { %v432_v43 = vadd.f32 %v431_v41, %v430_v39  ;;  %v452_v44 = vrot.slane %v451_v42, 4 }
 0x110   : > { %v433_v45 = vrot.slane %v432_v43, 2  ;;  %v453_v46 = vadd.f32 %v452_v44, %v451_v42 }
 0x112   : > { %v434_v47 = vadd.f32 %v433_v45, %v432_v43  ;;  %v454_v48 = vrot.slane %v453_v46, 2 }
 0x114   : > { %v435_v49 = vrot.slane %v434_v47, 1  ;;  %v455_v50 = vadd.f32 %v454_v48, %v453_v46 }
 0x116   : > { %v436_v51 = vadd.f32 %v435_v49, %v434_v47  ;;  %v456_v52 = vrot.slane %v455_v50, 1 }
 0x118   : > { %v457_v53 = vadd.f32 %v456_v52, %v455_v50  ;;  %462 = vst [vmem:[%s250_s23] sm:$0x1] %v436_v51 }
 0x11a   : > { %463 = vst [vmem:[%s253_s26] sm:$0x1] %v457_v53 }
 0x11b PF: > { %s15_s17 = sadd.s32 1, %s746_s17   ;;  %s853_s15 = smov %s742_s16 }
 0x11c   : > { %p12_p5 = scmp.ge.s32.totalorder %s15_s17, 4   ;;  %s854_s16 = smov %s856_s18 }
 0x11e   :  { %14 = sbr.rel (!%p12_p5) target bundleno = 2 (0x2), region = 90 }

</bundles_post_ra>
